<compile_context>
chip_gen: v5e
topology: v5e:2x2
jax: 0.10.0
libtpu: 0.0.40
codegen_flags: <defaults>
</compile_context>

<pallas_src>
import jax
import jax.numpy as jnp
from jax.experimental import pallas as pl
from jax.experimental.pallas import tpu as pltpu


EPS = 1e-8
DEFAULT_VMEM_LIMIT = 48 * 1024 * 1024  # below physical on v5e/v6e/v7x


def rmsnorm_kernel(x_ref, g_ref, o_ref):
    # x_ref: (tile_rows, C), g_ref: (1, C), o_ref: (tile_rows, C)
    x = x_ref[...].astype(jnp.float32)
    g = g_ref[...].astype(jnp.float32)            # (1, C), broadcasts over rows
    c = x.shape[-1]
    ms = jnp.sum(x * x, axis=-1, keepdims=True) * (1.0 / c)  # mean of squares
    rms = jnp.sqrt(ms)                             # matches torch: mean(x**2)**0.5
    # eps stays OUTSIDE the sqrt, exactly like the PyTorch forward.
    inv = pl.reciprocal(rms + EPS, approx=False)   # approx=True loosens past 1e-5
    o_ref[...] = (g * (x * inv)).astype(o_ref.dtype)


def _pick_row_tile(rows, C, itemsize, vmem_limit_bytes):
    # Sublane packing: f32 -> 8 rows, bf16 -> 16, int8/fp8 -> 32.
    row_mult = {4: 8, 2: 16, 1: 32}.get(itemsize, 8)
    # Budget against half the scoped VMEM limit; factor ~6 covers
    # double-buffered input + output plus the in-kernel f32 temporaries.
    budget = vmem_limit_bytes // 2
    per_row = max(1, C * itemsize * 6)
    tile = min(512, budget // per_row)
    tile = max(row_mult, (tile // row_mult) * row_mult)
    # Don't make the tile larger than the (row-aligned) data itself.
    rows_aligned = ((rows + row_mult - 1) // row_mult) * row_mult
    tile = min(tile, rows_aligned)
    return tile, row_mult


def rmsnorm(x, g, *, row_tile=None, vmem_limit_bytes=DEFAULT_VMEM_LIMIT):
    """x: (B, T, C) float array, g: (C,) gain. Returns (B, T, C)."""
    B, T, C = x.shape
    rows = B * T
    x2d = x.reshape(rows, C)
    g2d = g.reshape(1, C)

    itemsize = jnp.dtype(x.dtype).itemsize
    auto_tile, row_mult = _pick_row_tile(rows, C, itemsize, vmem_limit_bytes)
    if row_tile is None:
        tile = auto_tile
    else:
        tile = max(row_mult, (row_tile // row_mult) * row_mult)

    # Pad rows up to a multiple of the tile. Padded rows are zeros:
    # rms = 0 -> y = 0 / eps = 0, so they are harmless and sliced off below.
    rows_padded = ((rows + tile - 1) // tile) * tile
    if rows_padded != rows:
        x2d = jnp.pad(x2d, ((0, rows_padded - rows), (0, 0)))

    # NOTE: for real d_model (e.g. 1024) C is a multiple of 128, so output
    # stores are lane-dense. C=32 here is toy-sized only; don't tune on it.
    out2d = pl.pallas_call(
        rmsnorm_kernel,
        out_shape=jax.ShapeDtypeStruct((rows_padded, C), x.dtype),
        grid_spec=pltpu.PrefetchScalarGridSpec(
            num_scalar_prefetch=0,
            grid=(rows_padded // tile,),
            in_specs=[
                pl.BlockSpec((tile, C), lambda i: (i, 0)),
                pl.BlockSpec((1, C), lambda i: (0, 0)),
            ],
            out_specs=pl.BlockSpec((tile, C), lambda i: (i, 0)),
        ),
        compiler_params=pltpu.CompilerParams(
            dimension_semantics=("parallel",),
            vmem_limit_bytes=vmem_limit_bytes,
        ),
    )(x2d, g2d)

    if rows_padded != rows:
        out2d = out2d[:rows]
    return out2d.reshape(B, T, C)


if __name__ == "__main__":
    # Small shapes consistent with the module's (B, T, C) forward.
    B, T, C = 2, 8, 32
    key = jax.random.PRNGKey(0)
    x = jax.random.normal(key, (B, T, C), dtype=jnp.float32)
    # Deterministic parameter init: nn.Parameter(torch.ones(d_model)) -> ones.
    g = jnp.ones((C,), dtype=jnp.float32)

    out = rmsnorm(x, g)
    out = jax.block_until_ready(out)

    # Reference check in plain JAX (same math as the PyTorch forward).
    rms = jnp.sqrt(jnp.mean(x ** 2, axis=-1, keepdims=True))
    ref = g * (x / (rms + EPS))
    assert jnp.allclose(out, ref, atol=1e-5, rtol=1e-5)

    # Also exercise a non-dividing, larger row count to cover the padding path.
    B2, T2, C2 = 3, 37, 128
    x2 = jax.random.normal(jax.random.PRNGKey(1), (B2, T2, C2), dtype=jnp.float32)
    g2 = jnp.ones((C2,), dtype=jnp.float32)
    out2 = jax.block_until_ready(rmsnorm(x2, g2))
    rms2 = jnp.sqrt(jnp.mean(x2 ** 2, axis=-1, keepdims=True))
    ref2 = g2 * (x2 / (rms2 + EPS))
    assert jnp.allclose(out2, ref2, atol=1e-5, rtol=1e-5)

    print("KERNEL_OK")
</pallas_src>

<mosaic_0001>
module attributes {stable_mosaic.version = 11 : i64} {
  func.func @rmsnorm_kernel(%arg0: i32, %arg1: memref<16x32xf32, #tpu.memory_space<vmem>>, %arg2: memref<1x32xf32, #tpu.memory_space<vmem>>, %arg3: memref<16x32xf32, #tpu.memory_space<vmem>>) attributes {dimension_semantics = [#tpu.dimension_semantics<parallel>], iteration_bounds = array<i64: 1>, scalar_prefetch = 0 : i64, scratch_operands = 0 : i64, tpu.core_type = #tpu.core_type<tc>, window_params = [{transform_indices = @transform_0, window_bounds = array<i64: 16, 32>}, {pipeline_mode = #tpu.pipeline_mode<synchronous>, transform_indices = @transform_1, window_bounds = array<i64: 1, 32>}, {transform_indices = @transform_2, window_bounds = array<i64: 16, 32>}]} {
    %c0 = arith.constant 0 : index
    %c0_0 = arith.constant 0 : index
    %0 = vector.load %arg1[%c0, %c0_0] : memref<16x32xf32, #tpu.memory_space<vmem>>, vector<16x32xf32>
    %c0_1 = arith.constant 0 : index
    %c0_2 = arith.constant 0 : index
    %1 = vector.load %arg2[%c0_1, %c0_2] : memref<1x32xf32, #tpu.memory_space<vmem>>, vector<1x32xf32>
    %2 = arith.mulf %0, %0 : vector<16x32xf32>
    %cst = arith.constant dense<0.000000e+00> : vector<16xf32>
    %3 = vector.multi_reduction <add>, %2, %cst [1] : vector<16x32xf32> to vector<16xf32>
    %4 = vector.shape_cast %3 : vector<16xf32> to vector<16x1xf32>
    %cst_3 = arith.constant 3.125000e-02 : f32
    %5 = vector.broadcast %cst_3 : f32 to vector<16x1xf32>
    %6 = arith.mulf %4, %5 : vector<16x1xf32>
    %7 = math.sqrt %6 : vector<16x1xf32>
    %cst_4 = arith.constant 9.99999993E-9 : f32
    %8 = vector.broadcast %cst_4 : f32 to vector<16x1xf32>
    %9 = arith.addf %7, %8 : vector<16x1xf32>
    %10 = tpu.reciprocal %9 : vector<16x1xf32> -> vector<16x1xf32>
    %11 = vector.broadcast %10 : vector<16x1xf32> to vector<16x32xf32>
    %12 = arith.mulf %0, %11 : vector<16x32xf32>
    %13 = vector.broadcast %1 : vector<1x32xf32> to vector<16x32xf32>
    %14 = arith.mulf %13, %12 : vector<16x32xf32>
    %c0_5 = arith.constant 0 : index
    %c0_6 = arith.constant 0 : index
    %15 = vector.load %arg3[%c0_5, %c0_6] : memref<16x32xf32, #tpu.memory_space<vmem>>, vector<16x32xf32>
    tpu.vector_store %arg3[%c0_5, %c0_6], %14 {strides = array<i32>} : memref<16x32xf32, #tpu.memory_space<vmem>>, vector<16x32xf32>,
    return
  }
  func.func @transform_0(%arg0: i32) -> (i32, i32) {
    %c0_i32 = arith.constant 0 : i32
    %c0_i32_0 = arith.constant 0 : i32
    return %arg0, %c0_i32 : i32, i32
  }
  func.func @transform_1(%arg0: i32) -> (i32, i32) {
    %c0_i32 = arith.constant 0 : i32
    %c0_i32_0 = arith.constant 0 : i32
    %c0_i32_1 = arith.constant 0 : i32
    return %c0_i32, %c0_i32_0 : i32, i32
  }
  func.func @transform_2(%arg0: i32) -> (i32, i32) {
    %c0_i32 = arith.constant 0 : i32
    %c0_i32_0 = arith.constant 0 : i32
    return %arg0, %c0_i32 : i32, i32
  }
}

</mosaic_0001>

<bundles_post_ra>
// kernel: tpu_custom_call.1
= control target key start
LH: loop header
LB: loop body
LE: loop exit
PB: predicated region body
PF: predicated region fallthrough
CT: control target
= control target key end

     0   :  { %7 = vsyncpa [#allocation3], 0  ;;  %s275_s0 = inlined_call_operand.hbm [shape: f32[16,32], index: 0, kind: input, shape index: {}]   ;;  %s276_s1 = inlined_call_operand.hbm [shape: f32[1,32], index: 1, kind: input, shape index: {}]   ;;  %s277_s2 = inlined_call_operand.hbm [shape: f32[16,32], index: 2, kind: output, shape index: {}]  }
   0x1   :  { %8 = vsyncpa [#allocation6], 0 }
   0x2   :  { %9 = vsyncpa [#allocation4], 0  ;;  %s14_s11 = sshll.u32 %s275_s0, 4  ;;  %s231_s12 = smov [#allocation2]   ;;  %s15_s11 = int_to_ptr.hbm [resolvable:$true] %s14_s11 }
   0x3   :  { %s16_s13 = sshll.u32 %s231_s12, 4  ;;  %s28_s16 = sshll.u32 %s276_s1, 4  ;;  %s17_s13 = int_to_ptr.vmem [resolvable:$true] %s16_s13  ;;  %s29_s16 = int_to_ptr.hbm [resolvable:$true] %s28_s16 }
   0x4   :  { %s232_s17 = smov 128   ;;  %s233_s18 = smov 8  }
   0x5   :  { %22 = dma.hbm_to_vmem [thread:$0]  %s15_s11, 256, %s17_s13, [#allocation3], %s232_s17, %s232_s17, %s233_s18  }
   0x6   :  { %s234_s19 = smov [#allocation5]  }
   0x7   :  { %s30_s20 = sshll.u32 %s234_s19, 4  ;;  %s31_s20 = int_to_ptr.vmem [resolvable:$true] %s30_s20 }
   0x8   :  { %33 = dma.hbm_to_vmem [thread:$0]  %s29_s16, 16, %s31_s20, [#allocation6]  }
   0x9   :  { %225 = dma.done.wait [#allocation3], 256  }
   0xa   :  { %226 = vsyncadd [#allocation3], 4294967040 }
   0xb   :  { %227 = dma.done.wait [#allocation6], 16  }
   0xc   :  { %228 = vsyncadd [#allocation6], 4294967280  ;;  %v42_v0 = vld [vmem:[#allocation2] sm:$0xff]  ;;  %vm47_vm0 = vcmask 261120   ;;  %v260_v2 = vld [vmem:[#allocation2 + $0x8] sm:$0xff]  ;;  %s235_s0 = smov [#allocation7]  }
   0xd   :  { %v45_v1 = vmul.f32 %v42_v0, %v42_v0  ;;  %v46_v4 = vmul.f32 %v260_v2, %v260_v2  ;;  %v144_v43 = vld [vmem:[#allocation5] ss:$0 sm:$0xff]  ;;  %s123_s1 = sshll.u32 %s235_s0, 4  ;;  %s125_s23 = sshll.u32 %s277_s2, 4  ;;  %s124_s1 = int_to_ptr.vmem [resolvable:$true] %s123_s1  ;;  %s126_s23 = int_to_ptr.hbm [resolvable:$true] %s125_s23 }
   0xf   :  { %v48_v3 = vsel %vm47_vm0, %v45_v1, 0.0  ;;  %v51_v5 = vsel %vm47_vm0, %v46_v4, 0.0 }
  0x10   :  { %49 = vadd.xlane.f32.xlu0 %v48_v3 }
  0x18   :  { %52 = vadd.xlane.f32.xlu0 %v51_v5 }
  0x83   :  { %v50_v6 = vpop.xlane.xlu0 %49 }
  0x84   :  { %v54_v7 = vmul.f32 0.03125, %v50_v6 }
  0x86   :  { %145 = vrsqrt.f32 %v54_v7  ;;  %vm63_vm1 = vcmp.eq.f32.partialorder %v54_v7, inf  ;;  %v66_v20 = vand.u32 2147483648, %v54_v7  ;;  %vm65_vm2 = vcmp.eq.f32.partialorder %v54_v7, 0.0 }
  0x8b   :  { %v53_v8 = vpop.xlane.xlu0 %52 }
  0x8c   :  { %v146_v9 = vpop.eup %145  ;;  %v55_v10 = vmul.f32 0.03125, %v53_v8 }
  0x8d   :  { %v57_v11 = vmul.f32 %v146_v9, %v54_v7 }
  0x8e   :  { %147 = vrsqrt.f32 %v55_v10  ;;  %vm75_vm3 = vcmp.eq.f32.partialorder %v55_v10, inf  ;;  %v78_v28 = vand.u32 2147483648, %v55_v10  ;;  %vm77_vm4 = vcmp.eq.f32.partialorder %v55_v10, 0.0 }
  0x8f   :  { %v58_v12 = vmul.f32 %v146_v9, %v57_v11 }
  0x91   :  { %v59_v13 = vmul.f32 0.5, %v58_v12 }
  0x93   :  { %v60_v14 = vsub.f32 1.5, %v59_v13 }
  0x94   :  { %v148_v15 = vpop.eup %147 }
  0x95   :  { %v61_v16 = vmul.f32 %v146_v9, %v60_v14  ;;  %v69_v17 = vmul.f32 %v148_v15, %v55_v10 }
  0x97   :  { %v62_v18 = vmul.f32 %v61_v16, %v54_v7  ;;  %v70_v19 = vmul.f32 %v148_v15, %v69_v17 }
  0x99   :  { %v64_v21 = vsel %vm63_vm1, %v54_v7, %v62_v18  ;;  %v71_v22 = vmul.f32 0.5, %v70_v19 }
  0x9a   :  { %v67_v23 = vsel %vm65_vm2, %v66_v20, %v64_v21 }
  0x9b   :  { %v80_v24 = vadd.f32 1e-08, %v67_v23  ;;  %v72_v25 = vsub.f32 1.5, %v71_v22 }
  0x9d   :  { %149 = vrcp.f32 %v80_v24  ;;  %v73_v26 = vmul.f32 %v148_v15, %v72_v25  ;;  %v93_v35 = vand.u32 2147483648, %v80_v24  ;;  %v91_v37 = vand.u32 2147483647, %v80_v24 }
  0x9e   :  { %vm87_vm6 = vweird.f32 %v80_v24 }
  0x9f   :  { %v74_v27 = vmul.f32 %v73_v26, %v55_v10  ;;  %v94_v40 = vor.u32 1.1754944e-38, %v93_v35  ;;  %vm92_vm8 = vcmp.eq.f32.partialorder %v91_v37, 8.507059e+37 }
  0xa1   :  { %v76_v29 = vsel %vm75_vm3, %v55_v10, %v74_v27 }
  0xa2   :  { %v79_v30 = vsel %vm77_vm4, %v78_v28, %v76_v29 }
  0xa3   :  { %v150_v31 = vpop.eup %149  ;;  %v81_v32 = vadd.f32 1e-08, %v79_v30 }
  0xa4   :  { %v83_v33 = vmul.f32 %v150_v31, %v80_v24  ;;  %vm88_vm5 = vweird.f32 %v150_v31 }
  0xa5   :  { %151 = vrcp.f32 %v81_v32  ;;  %vm89_vm7 = vmor %vm87_vm6, %vm88_vm5  ;;  %v107_v47 = vand.u32 2147483648, %v81_v32  ;;  %v105_v49 = vand.u32 2147483647, %v81_v32  ;;  %vm101_vm10 = vweird.f32 %v81_v32 }
  0xa6   :  { %v84_v34 = vsub.f32 1.0, %v83_v33 }
  0xa7   :  { %v108_v52 = vor.u32 1.1754944e-38, %v107_v47  ;;  %vm106_vm12 = vcmp.eq.f32.partialorder %v105_v49, 8.507059e+37 }
  0xa8   :  { %v85_v36 = vmul.f32 %v150_v31, %v84_v34 }
  0xaa   :  { %v86_v38 = vadd.f32 %v150_v31, %v85_v36 }
  0xab   :  { %v152_v39 = vpop.eup %151 }
  0xac   :  { %v90_v41 = vsel %vm89_vm7, %v150_v31, %v86_v38  ;;  %v97_v42 = vmul.f32 %v152_v39, %v81_v32  ;;  %vm102_vm9 = vweird.f32 %v152_v39 }
  0xad   :  { %v95_v44 = vsel %vm92_vm8, %v94_v40, %v90_v41  ;;  %vm103_vm11 = vmor %vm101_vm10, %vm102_vm9 }
  0xae   :  { %v98_v45 = vsub.f32 1.0, %v97_v42  ;;  %v110_v46 = vmul.f32 %v95_v44, %v42_v0 }
  0xb0   :  { %v99_v48 = vmul.f32 %v152_v39, %v98_v45  ;;  %v115_v50 = vmul.f32 %v144_v43, %v110_v46 }
  0xb2   :  { %v100_v51 = vadd.f32 %v152_v39, %v99_v48  ;;  %117 = vst.msk [vmem:[#allocation7] sm:$0xff] %vm47_vm0, %v115_v50 }
  0xb4   :  { %v104_v53 = vsel %vm103_vm11, %v152_v39, %v100_v51 }
  0xb5   :  { %v109_v54 = vsel %vm106_vm12, %v108_v52, %v104_v53 }
  0xb6   :  { %v111_v55 = vmul.f32 %v109_v54, %v260_v2 }
  0xb8   :  { %v116_v56 = vmul.f32 %v144_v43, %v111_v55 }
  0xba   :  { %118 = vst.msk [vmem:[#allocation7 + $0x8] sm:$0xff] %vm47_vm0, %v116_v56 }
  0xbb   :  { %131 = dma.vmem_to_hbm [thread:$0]  %s124_s1, 256, %s126_s23, [#allocation4], %s232_s17, %s232_s17, %s233_s18  }
  0xbc   :  { %229 = dma.done.wait [#allocation4], 256  }
  0xbd   :  { %230 = vsyncadd [#allocation4], 4294967040 }
  0xbe   :  { %136 = vsyncpa [#allocation3], 1 }
  0xbf   :  { %137 = vsyncpa [#allocation6], 1 }
  0xc0   :  { %138 = vsyncpa [#allocation4], 1 }

</bundles_post_ra>
